<compile_context>
chip_gen: v6e
topology: v6e:2x2x1
jax: 0.10.0
libtpu: 0.0.40
codegen_flags: <defaults>
</compile_context>

<pallas_src>
import jax
import jax.numpy as jnp
from jax.experimental import pallas as pl
from jax.experimental.pallas import tpu as pltpu


def _make_kernel(r, c_out):
    """1x1 conv + bias + ReLU, then fused pixel shuffle, per (batch, row-block)."""

    def kernel(x_ref, w_ref, b_ref, q_ref, o_ref):
        # x_ref: (1, C_in, TH, W)        NCHW input row block
        # w_ref: (C_in, C_pre, 1, 1)     1x1 conv weight, rows ordered (dr,dw,c)
        # b_ref: (C_pre, 1, 1)           bias, same ordering
        # q_ref: (r*r, W, r*W*r)         constant one-hot shuffle matrices
        # o_ref: (1, C_out, TH, r*W*r)   output block, final NCHW memory order
        x = x_ref[0].astype(jnp.float32)              # (C_in, TH, W)
        c_in, th, w = x.shape
        c_pre = b_ref.shape[0]
        rwr = q_ref.shape[2]

        # ---- 1x1 conv as per-input-channel scaled accumulation (VPU). ----
        s = jnp.zeros((c_pre, th, w), jnp.float32)
        for k in range(c_in):                          # static, tiny C_in
            s = s + w_ref[k] * x[k][None, :, :]        # (C_pre,1,1) * (1,TH,W)
        s = jnp.maximum(s + b_ref[...], 0.0)           # bias + ReLU -> (C_pre,TH,W)

        # ---- PixelShuffle fused as r*r one-hot matmuls on the idle MXU. ----
        t = jnp.zeros((c_out * th, rwr), jnp.float32)
        for p in range(r * r):                         # static, r*r groups
            sp = s[p * c_out:(p + 1) * c_out].reshape(c_out * th, w)
            t = t + jnp.dot(sp, q_ref[p], preferred_element_type=jnp.float32)
        o_ref[0] = t.reshape(c_out, th, rwr).astype(o_ref.dtype)

    return kernel


def _pick_tile_h(H, W, C_in, C_pre, C_out, r, itemsize,
                 budget_bytes=6 * 1024 * 1024):
    """Largest row block (multiple of 8 dividing H, or H itself) within budget."""
    rwr = r * W * r

    def tile_bytes(th):
        io = 2 * th * (C_in * W + C_out * rwr) * itemsize    # double-buffered blocks
        consts = 2 * 4 * (C_pre * C_in + C_pre + r * r * W * rwr)
        scratch = 4 * th * (C_pre * W + 2 * C_out * rwr)     # in-kernel f32 temps
        return io + consts + scratch

    cands = sorted({d for d in range(8, H, 8) if H % d == 0} | {H})
    fitting = [d for d in cands if tile_bytes(d) <= budget_bytes]
    return max(fitting) if fitting else min(cands)


def pix_shuffle_upsampler(x, weight, bias, upsample_factor=2, tile_h=None):
    """Forward of PixShuffleUpsampler (use_bn=False, relu, bias, no blur).

    x:      (N, C_in, H, W)  NCHW, as in PyTorch
    weight: (C_pre, C_in)    with C_pre = output_dim * r*r (1x1 conv weight)
    bias:   (C_pre,)
    returns (N, output_dim, H*r, W*r) NCHW
    """
    N, C_in, H, W = x.shape
    r = int(upsample_factor)
    C_pre = weight.shape[0]
    assert weight.shape == (C_pre, C_in) and C_pre % (r * r) == 0
    C_out = C_pre // (r * r)
    rwr = r * W * r

    # Reorder conv output channels from PyTorch's (c, dr, dw) order to
    # (dr, dw, c) so each sub-pixel group is a contiguous row slice in-kernel.
    w2 = weight.reshape(C_out, r, r, C_in).transpose(1, 2, 0, 3).reshape(C_pre, C_in)
    w_k = jnp.transpose(w2).reshape(C_in, C_pre, 1, 1).astype(jnp.float32)
    b_k = bias.reshape(C_out, r, r).transpose(1, 2, 0).reshape(C_pre, 1, 1)
    b_k = b_k.astype(jnp.float32)

    # One-hot shuffle matrices: Q[dr*r+dw, w, dr*(W*r) + w*r + dw] = 1.
    p_idx = jnp.arange(r * r)
    dr = (p_idx // r)[:, None]
    dw = (p_idx % r)[:, None]
    w_idx = jnp.arange(W)[None, :]
    tgt = dr * (W * r) + w_idx * r + dw                       # (r*r, W)
    q_k = (tgt[..., None] == jnp.arange(rwr)[None, None, :]).astype(jnp.float32)

    itemsize = jnp.dtype(x.dtype).itemsize
    if tile_h is None:
        tile_h = _pick_tile_h(H, W, C_in, C_pre, C_out, r, itemsize)
    assert H % tile_h == 0 and (tile_h % 8 == 0 or tile_h == H)

    grid = (N, H // tile_h)

    flops = 2 * N * H * W * C_in * C_pre             # 1x1 conv
    flops += 2 * N * H * W * C_out * rwr * r * r     # fused shuffle matmuls
    bytes_accessed = (x.size * itemsize + N * C_out * H * rwr * itemsize
                      + 4 * (w_k.size + b_k.size + q_k.size))
    cost = pl.CostEstimate(flops=int(flops), transcendentals=0,
                           bytes_accessed=int(bytes_accessed))

    out = pl.pallas_call(
        _make_kernel(r, C_out),
        out_shape=jax.ShapeDtypeStruct((N, C_out, H, rwr), x.dtype),
        grid_spec=pltpu.PrefetchScalarGridSpec(
            num_scalar_prefetch=0,
            grid=grid,
            in_specs=[
                pl.BlockSpec((1, C_in, tile_h, W), lambda n, hb: (n, 0, hb, 0)),
                pl.BlockSpec((C_in, C_pre, 1, 1), lambda n, hb: (0, 0, 0, 0)),
                pl.BlockSpec((C_pre, 1, 1), lambda n, hb: (0, 0, 0)),
                pl.BlockSpec((r * r, W, rwr), lambda n, hb: (0, 0, 0)),
            ],
            out_specs=pl.BlockSpec((1, C_out, tile_h, rwr),
                                   lambda n, hb: (n, 0, hb, 0)),
        ),
        compiler_params=pltpu.CompilerParams(
            dimension_semantics=("parallel", "parallel")),
        cost_estimate=cost,
    )(x, w_k, b_k, q_k)

    # (N, C_out, H, r*W*r) and (N, C_out, H*r, W*r) share the same row-major
    # memory order: this reshape is free (no transpose / extra HBM pass).
    return out.reshape(N, C_out, H * r, W * r)


if __name__ == "__main__":
    # Module config: input_dim=4, output_dim=4, upsample_factor=2.
    N, C_in, H, W = 2, 4, 16, 16
    output_dim, r = 4, 2
    C_pre = output_dim * r * r  # 16

    key = jax.random.PRNGKey(0)
    kx, kw, kb = jax.random.split(key, 3)
    x = jax.random.normal(kx, (N, C_in, H, W), dtype=jnp.float32)
    # 1x1 conv weight (C_pre, C_in, 1, 1) -> (C_pre, C_in), plus bias.
    weight = jax.random.normal(kw, (C_pre, C_in), dtype=jnp.float32) * 0.1
    bias = jax.random.normal(kb, (C_pre,), dtype=jnp.float32) * 0.1

    out = pix_shuffle_upsampler(x, weight, bias, upsample_factor=r)
    out = jax.block_until_ready(out)

    # Exact-f32 reference (same math as the PyTorch module).
    conv_ref = jnp.sum(weight[None, :, :, None, None] * x[:, None, :, :, :], axis=2)
    conv_ref = jnp.maximum(conv_ref + bias[None, :, None, None], 0.0)
    ref = conv_ref.reshape(N, output_dim, r, r, H, W)
    ref = jnp.transpose(ref, (0, 1, 4, 2, 5, 3)).reshape(N, output_dim, H * r, W * r)

    assert out.shape == (N, output_dim, H * r, W * r)
    assert jnp.allclose(out, ref, atol=5e-3, rtol=5e-3), "mismatch vs reference"

    print("KERNEL_OK")
</pallas_src>

<mosaic_0001>
module attributes {stable_mosaic.version = 11 : i64} {
  func.func @kernel(%arg0: i32, %arg1: i32, %arg2: memref<1x4x16x16xf32, #tpu.memory_space<vmem>>, %arg3: memref<4x16x1x1xf32, #tpu.memory_space<vmem>>, %arg4: memref<16x1x1xf32, #tpu.memory_space<vmem>>, %arg5: memref<4x16x64xf32, #tpu.memory_space<vmem>>, %arg6: memref<1x4x16x64xf32, #tpu.memory_space<vmem>>) attributes {dimension_semantics = [#tpu.dimension_semantics<parallel>, #tpu.dimension_semantics<parallel>], iteration_bounds = array<i64: 2, 1>, scalar_prefetch = 0 : i64, scratch_operands = 0 : i64, tpu.core_type = #tpu.core_type<tc>, window_params = [{transform_indices = @transform_0, window_bounds = array<i64: 1, 4, 16, 16>}, {pipeline_mode = #tpu.pipeline_mode<synchronous>, transform_indices = @transform_1, window_bounds = array<i64: 4, 16, 1, 1>}, {pipeline_mode = #tpu.pipeline_mode<synchronous>, transform_indices = @transform_2, window_bounds = array<i64: 16, 1, 1>}, {pipeline_mode = #tpu.pipeline_mode<synchronous>, transform_indices = @transform_3, window_bounds = array<i64: 4, 16, 64>}, {transform_indices = @transform_4, window_bounds = array<i64: 1, 4, 16, 64>}]} {
    %c0 = arith.constant 0 : index
    %c0_0 = arith.constant 0 : index
    %c0_1 = arith.constant 0 : index
    %c0_2 = arith.constant 0 : index
    %0 = vector.load %arg2[%c0, %c0_0, %c0_1, %c0_2] : memref<1x4x16x16xf32, #tpu.memory_space<vmem>>, vector<1x4x16x16xf32>
    %1 = vector.shape_cast %0 : vector<1x4x16x16xf32> to vector<4x16x16xf32>
    %cst = arith.constant 0.000000e+00 : f32
    %2 = vector.broadcast %cst : f32 to vector<16x16x16xf32>
    %c0_3 = arith.constant 0 : index
    %c0_4 = arith.constant 0 : index
    %c0_5 = arith.constant 0 : index
    %c0_6 = arith.constant 0 : index
    %3 = vector.load %arg3[%c0_3, %c0_4, %c0_5, %c0_6] : memref<4x16x1x1xf32, #tpu.memory_space<vmem>>, vector<1x16x1x1xf32>
    %4 = vector.shape_cast %3 : vector<1x16x1x1xf32> to vector<16x1x1xf32>
    %5 = vector.extract_strided_slice %1 {offsets = [0, 0, 0], sizes = [1, 16, 16], strides = [1, 1, 1]} : vector<4x16x16xf32> to vector<1x16x16xf32>
    %6 = vector.shape_cast %5 : vector<1x16x16xf32> to vector<16x16xf32>
    %7 = vector.shape_cast %6 : vector<16x16xf32> to vector<1x16x16xf32>
    %8 = vector.broadcast %4 : vector<16x1x1xf32> to vector<16x16x16xf32>
    %9 = vector.broadcast %7 : vector<1x16x16xf32> to vector<16x16x16xf32>
    %10 = arith.mulf %8, %9 : vector<16x16x16xf32>
    %11 = arith.addf %2, %10 : vector<16x16x16xf32>
    %c1 = arith.constant 1 : index
    %c0_7 = arith.constant 0 : index
    %c0_8 = arith.constant 0 : index
    %c0_9 = arith.constant 0 : index
    %12 = vector.load %arg3[%c1, %c0_7, %c0_8, %c0_9] : memref<4x16x1x1xf32, #tpu.memory_space<vmem>>, vector<1x16x1x1xf32>
    %13 = vector.shape_cast %12 : vector<1x16x1x1xf32> to vector<16x1x1xf32>
    %14 = vector.extract_strided_slice %1 {offsets = [1, 0, 0], sizes = [1, 16, 16], strides = [1, 1, 1]} : vector<4x16x16xf32> to vector<1x16x16xf32>
    %15 = vector.shape_cast %14 : vector<1x16x16xf32> to vector<16x16xf32>
    %16 = vector.shape_cast %15 : vector<16x16xf32> to vector<1x16x16xf32>
    %17 = vector.broadcast %13 : vector<16x1x1xf32> to vector<16x16x16xf32>
    %18 = vector.broadcast %16 : vector<1x16x16xf32> to vector<16x16x16xf32>
    %19 = arith.mulf %17, %18 : vector<16x16x16xf32>
    %20 = arith.addf %11, %19 : vector<16x16x16xf32>
    %c2 = arith.constant 2 : index
    %c0_10 = arith.constant 0 : index
    %c0_11 = arith.constant 0 : index
    %c0_12 = arith.constant 0 : index
    %21 = vector.load %arg3[%c2, %c0_10, %c0_11, %c0_12] : memref<4x16x1x1xf32, #tpu.memory_space<vmem>>, vector<1x16x1x1xf32>
    %22 = vector.shape_cast %21 : vector<1x16x1x1xf32> to vector<16x1x1xf32>
    %23 = vector.extract_strided_slice %1 {offsets = [2, 0, 0], sizes = [1, 16, 16], strides = [1, 1, 1]} : vector<4x16x16xf32> to vector<1x16x16xf32>
    %24 = vector.shape_cast %23 : vector<1x16x16xf32> to vector<16x16xf32>
    %25 = vector.shape_cast %24 : vector<16x16xf32> to vector<1x16x16xf32>
    %26 = vector.broadcast %22 : vector<16x1x1xf32> to vector<16x16x16xf32>
    %27 = vector.broadcast %25 : vector<1x16x16xf32> to vector<16x16x16xf32>
    %28 = arith.mulf %26, %27 : vector<16x16x16xf32>
    %29 = arith.addf %20, %28 : vector<16x16x16xf32>
    %c3 = arith.constant 3 : index
    %c0_13 = arith.constant 0 : index
    %c0_14 = arith.constant 0 : index
    %c0_15 = arith.constant 0 : index
    %30 = vector.load %arg3[%c3, %c0_13, %c0_14, %c0_15] : memref<4x16x1x1xf32, #tpu.memory_space<vmem>>, vector<1x16x1x1xf32>
    %31 = vector.shape_cast %30 : vector<1x16x1x1xf32> to vector<16x1x1xf32>
    %32 = vector.extract_strided_slice %1 {offsets = [3, 0, 0], sizes = [1, 16, 16], strides = [1, 1, 1]} : vector<4x16x16xf32> to vector<1x16x16xf32>
    %33 = vector.shape_cast %32 : vector<1x16x16xf32> to vector<16x16xf32>
    %34 = vector.shape_cast %33 : vector<16x16xf32> to vector<1x16x16xf32>
    %35 = vector.broadcast %31 : vector<16x1x1xf32> to vector<16x16x16xf32>
    %36 = vector.broadcast %34 : vector<1x16x16xf32> to vector<16x16x16xf32>
    %37 = arith.mulf %35, %36 : vector<16x16x16xf32>
    %38 = arith.addf %29, %37 : vector<16x16x16xf32>
    %c0_16 = arith.constant 0 : index
    %c0_17 = arith.constant 0 : index
    %c0_18 = arith.constant 0 : index
    %39 = vector.load %arg4[%c0_16, %c0_17, %c0_18] : memref<16x1x1xf32, #tpu.memory_space<vmem>>, vector<16x1x1xf32>
    %40 = vector.broadcast %39 : vector<16x1x1xf32> to vector<16x16x16xf32>
    %41 = arith.addf %38, %40 : vector<16x16x16xf32>
    %cst_19 = arith.constant 0.000000e+00 : f32
    %42 = vector.broadcast %cst_19 : f32 to vector<16x16x16xf32>
    %43 = arith.maximumf %41, %42 : vector<16x16x16xf32>
    %cst_20 = arith.constant 0.000000e+00 : f32
    %44 = vector.broadcast %cst_20 : f32 to vector<64x64xf32>
    %45 = vector.extract_strided_slice %43 {offsets = [0, 0, 0], sizes = [4, 16, 16], strides = [1, 1, 1]} : vector<16x16x16xf32> to vector<4x16x16xf32>
    %46 = vector.shape_cast %45 : vector<4x16x16xf32> to vector<64x16xf32>
    %c0_21 = arith.constant 0 : index
    %c0_22 = arith.constant 0 : index
    %c0_23 = arith.constant 0 : index
    %47 = vector.load %arg5[%c0_21, %c0_22, %c0_23] : memref<4x16x64xf32, #tpu.memory_space<vmem>>, vector<1x16x64xf32>
    %48 = vector.shape_cast %47 : vector<1x16x64xf32> to vector<16x64xf32>
    %cst_24 = arith.constant dense<0.000000e+00> : vector<64x64xf32>
    %49 = tpu.matmul %46, %48, %cst_24 {dimension_numbers = #tpu.dot_dimension_numbers<[1], [0], [0], [1], [0, 0, 1, 1], [], []>} : vector<64x16xf32>, vector<16x64xf32>, vector<64x64xf32> -> vector<64x64xf32>
    %50 = arith.addf %44, %49 : vector<64x64xf32>
    %51 = vector.extract_strided_slice %43 {offsets = [4, 0, 0], sizes = [4, 16, 16], strides = [1, 1, 1]} : vector<16x16x16xf32> to vector<4x16x16xf32>
    %52 = vector.shape_cast %51 : vector<4x16x16xf32> to vector<64x16xf32>
    %c1_25 = arith.constant 1 : index
    %c0_26 = arith.constant 0 : index
    %c0_27 = arith.constant 0 : index
    %53 = vector.load %arg5[%c1_25, %c0_26, %c0_27] : memref<4x16x64xf32, #tpu.memory_space<vmem>>, vector<1x16x64xf32>
    %54 = vector.shape_cast %53 : vector<1x16x64xf32> to vector<16x64xf32>
    %cst_28 = arith.constant dense<0.000000e+00> : vector<64x64xf32>
    %55 = tpu.matmul %52, %54, %cst_28 {dimension_numbers = #tpu.dot_dimension_numbers<[1], [0], [0], [1], [0, 0, 1, 1], [], []>} : vector<64x16xf32>, vector<16x64xf32>, vector<64x64xf32> -> vector<64x64xf32>
    %56 = arith.addf %50, %55 : vector<64x64xf32>
    %57 = vector.extract_strided_slice %43 {offsets = [8, 0, 0], sizes = [4, 16, 16], strides = [1, 1, 1]} : vector<16x16x16xf32> to vector<4x16x16xf32>
    %58 = vector.shape_cast %57 : vector<4x16x16xf32> to vector<64x16xf32>
    %c2_29 = arith.constant 2 : index
    %c0_30 = arith.constant 0 : index
    %c0_31 = arith.constant 0 : index
    %59 = vector.load %arg5[%c2_29, %c0_30, %c0_31] : memref<4x16x64xf32, #tpu.memory_space<vmem>>, vector<1x16x64xf32>
    %60 = vector.shape_cast %59 : vector<1x16x64xf32> to vector<16x64xf32>
    %cst_32 = arith.constant dense<0.000000e+00> : vector<64x64xf32>
    %61 = tpu.matmul %58, %60, %cst_32 {dimension_numbers = #tpu.dot_dimension_numbers<[1], [0], [0], [1], [0, 0, 1, 1], [], []>} : vector<64x16xf32>, vector<16x64xf32>, vector<64x64xf32> -> vector<64x64xf32>
    %62 = arith.addf %56, %61 : vector<64x64xf32>
    %63 = vector.extract_strided_slice %43 {offsets = [12, 0, 0], sizes = [4, 16, 16], strides = [1, 1, 1]} : vector<16x16x16xf32> to vector<4x16x16xf32>
    %64 = vector.shape_cast %63 : vector<4x16x16xf32> to vector<64x16xf32>
    %c3_33 = arith.constant 3 : index
    %c0_34 = arith.constant 0 : index
    %c0_35 = arith.constant 0 : index
    %65 = vector.load %arg5[%c3_33, %c0_34, %c0_35] : memref<4x16x64xf32, #tpu.memory_space<vmem>>, vector<1x16x64xf32>
    %66 = vector.shape_cast %65 : vector<1x16x64xf32> to vector<16x64xf32>
    %cst_36 = arith.constant dense<0.000000e+00> : vector<64x64xf32>
    %67 = tpu.matmul %64, %66, %cst_36 {dimension_numbers = #tpu.dot_dimension_numbers<[1], [0], [0], [1], [0, 0, 1, 1], [], []>} : vector<64x16xf32>, vector<16x64xf32>, vector<64x64xf32> -> vector<64x64xf32>
    %68 = arith.addf %62, %67 : vector<64x64xf32>
    %69 = vector.shape_cast %68 : vector<64x64xf32> to vector<4x16x64xf32>
    %c0_37 = arith.constant 0 : index
    %c0_38 = arith.constant 0 : index
    %c0_39 = arith.constant 0 : index
    %c0_40 = arith.constant 0 : index
    %70 = vector.load %arg6[%c0_37, %c0_38, %c0_39, %c0_40] : memref<1x4x16x64xf32, #tpu.memory_space<vmem>>, vector<1x4x16x64xf32>
    %71 = vector.shape_cast %70 : vector<1x4x16x64xf32> to vector<4x16x64xf32>
    %72 = vector.shape_cast %69 : vector<4x16x64xf32> to vector<1x4x16x64xf32>
    tpu.vector_store %arg6[%c0_37, %c0_38, %c0_39, %c0_40], %72 {strides = array<i32>} : memref<1x4x16x64xf32, #tpu.memory_space<vmem>>, vector<1x4x16x64xf32>,
    return
  }
  func.func @transform_0(%arg0: i32, %arg1: i32) -> (i32, i32, i32, i32) {
    %c0_i32 = arith.constant 0 : i32
    %c0_i32_0 = arith.constant 0 : i32
    %c0_i32_1 = arith.constant 0 : i32
    return %arg0, %c0_i32, %arg1, %c0_i32_0 : i32, i32, i32, i32
  }
  func.func @transform_1(%arg0: i32, %arg1: i32) -> (i32, i32, i32, i32) {
    %c0_i32 = arith.constant 0 : i32
    %c0_i32_0 = arith.constant 0 : i32
    %c0_i32_1 = arith.constant 0 : i32
    %c0_i32_2 = arith.constant 0 : i32
    %c0_i32_3 = arith.constant 0 : i32
    return %c0_i32, %c0_i32_0, %c0_i32_1, %c0_i32_2 : i32, i32, i32, i32
  }
  func.func @transform_2(%arg0: i32, %arg1: i32) -> (i32, i32, i32) {
    %c0_i32 = arith.constant 0 : i32
    %c0_i32_0 = arith.constant 0 : i32
    %c0_i32_1 = arith.constant 0 : i32
    %c0_i32_2 = arith.constant 0 : i32
    return %c0_i32, %c0_i32_0, %c0_i32_1 : i32, i32, i32
  }
  func.func @transform_3(%arg0: i32, %arg1: i32) -> (i32, i32, i32) {
    %c0_i32 = arith.constant 0 : i32
    %c0_i32_0 = arith.constant 0 : i32
    %c0_i32_1 = arith.constant 0 : i32
    %c0_i32_2 = arith.constant 0 : i32
    return %c0_i32, %c0_i32_0, %c0_i32_1 : i32, i32, i32
  }
  func.func @transform_4(%arg0: i32, %arg1: i32) -> (i32, i32, i32, i32) {
    %c0_i32 = arith.constant 0 : i32
    %c0_i32_0 = arith.constant 0 : i32
    %c0_i32_1 = arith.constant 0 : i32
    return %arg0, %c0_i32, %arg1, %c0_i32_0 : i32, i32, i32, i32
  }
}

</mosaic_0001>

<bundles_post_ra>
// kernel: tpu_custom_call.1
= control target key start
LH: loop header
LB: loop body
LE: loop exit
PB: predicated region body
PF: predicated region fallthrough
CT: control target
= control target key end

     0   :  { %9 = vsyncpa [#allocation3], 0  ;;  %s3276_s0 = inlined_call_operand.hbm [shape: f32[2,4,16,16], index: 0, kind: input, shape index: {}]   ;;  %s3277_s1 = inlined_call_operand.vmem [shape: f32[4,16,1,1], index: 1, kind: input, shape index: {}]   ;;  %s3278_s2 = inlined_call_operand.vmem [shape: f32[16,1,1], index: 2, kind: input, shape index: {}]   ;;  %s3279_s3 = inlined_call_operand.vmem [shape: f32[4,16,64], index: 3, kind: input, shape index: {}]   ;;  %s3280_s4 = inlined_call_operand.hbm [shape: f32[2,4,16,64], index: 4, kind: output, shape index: {}]  }
   0x1   :  { %11 = vsyncpa [#allocation3 + $0x1], 0 }
   0x2   :  { %12 = vsyncpa [#allocation4], 0 }
   0x3   :  { %14 = vsyncpa [#allocation4 + $0x1], 0  ;;  %s2521_s15 = smov 0   ;;  %s2523_s16 = smov 0  }
   0x4   :  { %s2525_s17 = smov 0   ;;  %s2527_s18 = smov 0  }
   0x5   :  { %s2529_s19 = smov 0   ;;  %s2531_s20 = smov 0  }
   0x6 LB: > { %s2023_s21 = sadd.s32 4294967295, %s2487_s20   ;;  %s2024_s22 = sadd.s32 4294967294, %s2487_s20   ;;  %s2487_s20 = sphi %s2531_s20, %s20_s20   ;;  %s2483_s19 = sphi %s2529_s19, %s3291_s19   ;;  %s2479_s18 = sphi %s2527_s18, %s3290_s18   ;;  %s2475_s17 = sphi %s2525_s17, %s3289_s17   ;;  %s2471_s16 = sphi %s2523_s16, %s3288_s16   ;;  %s2467_s15 = sphi %s2521_s15, %s3287_s15  }
   0x7   : > { %s32_s23 = sadd.s32 1, %s2483_s19  ;;  %s41_s24 = sadd.s32 1, %s2475_s17 }
   0x8   : > { %p34_p0 = scmp.ge.s32.totalorder %s32_s23, 2  ;;  %p48_p1 = scmp.ne.s32.totalorder %s2475_s17, %s2471_s16 }
   0x9   : > { %p49_p2 = scmp.eq.s32.totalorder %s2487_s20, 0  ;;  %p54_p3 = scmp.ne.s32.totalorder %s2471_s16, %s2467_s15 }
   0xa   : > { %s3293_s23 = smov (%p34_p0, %s32_s23), 0  ;;  %p55_p5 = scmp.eq.s32.totalorder %s2023_s21, 0 }
   0xb   : > { %p2562_p4 = por %p49_p2, %p48_p1  ;;  %s36_s26 = ssub.s32 %s2483_s19, %s3293_s23 }
   0xc   : > { %p143_p6 = scmp.eq.s32.totalorder %s2023_s21, 1  ;;  %p39_p7 = scmp.eq.s32.totalorder %s36_s26, 0 }
   0xd   : > { %p2568_p8 = por %p55_p5, %p54_p3  ;;  %p149_p10 = scmp.eq.s32.totalorder %s2024_s22, 1 }
   0xe   : > { %p2572_p9 = por %p143_p6, %p48_p1  ;;  %p2322_p13 = scmp.lt.s32.totalorder %s2487_s20, 2 }
   0xf   : > { %s2577_s29 = scalar_select %p39_p7, %s2475_s17, %s41_s24  }
  0x10   : > { %p2579_p11 = por %p149_p10, %p54_p3  ;;  %s178_s5 = sand.u32 1, %s2475_s17  }
  0x11   : > { %s2027_s6 = sshll.u32 %s178_s5, 6  ;;  %s2204_s7 = sshll.u32 %s2483_s19, 10 }
  0x12   : > { %s190_s10 = scalar_lea.hbm %s3276_s0, %s2204_s7  ;;  %s182_s11 = scalar_lea.vmem [#allocation2], %s2027_s6 }
  0x13   : > { %s191_s12 = sshll.u32 %s182_s11, 4  ;;  %p2592_p0 = pnand %p2322_p13, %p2562_p4  ;;  %s192_s12 = int_to_ptr.vmem [resolvable:$true] %s191_s12 }
  0x14   : > { %p2030_p1 = scmp.ge.s32.totalorder %s2487_s20, 1  ;;  %s179_s14 = scalar_lea.sflag [#allocation3], %s178_s5 }
  0x15   : > { %p2381_p2 = pneg %p2592_p0  ;;  %s2392_s21 = scalar_lea.vmem %s192_s12, 1024 }
  0x16   : > { %p2393_p3 = scmp.ne.s32.totalorder %s192_s12, %s2392_s21  ;;  %s2489_s22 = smov [#allocation2]  }
  0x17   : > { %s2397_s24 = sshll.u32 %s2489_s22, 4  ;;  %s2398_s24 = int_to_ptr.vmem [resolvable:$false] %s2397_s24 }
  0x18   : > { %p2395_p5 = pnand %p2393_p3, %p2381_p2  ;;  %s2399_s26 = scalar_lea.vmem %s2398_s24, 2048 }
  0x19   : > { %p2400_p7 = scmp.lt.s32.totalorder %s192_s12, %s2398_s24  ;;  %p2401_p10 = scmp.lt.s32.totalorder %s2399_s26, %s2392_s21 }
  0x1a   : > { %p2396_p6 = pneg %p2395_p5 }
  0x1b   : > { %p2402_p12 = por %p2401_p10, %p2400_p7 }
  0x1d   : > { %p2403_p4 = pnand %p2402_p12, %p2396_p6 }
  0x1f   : > { %2406 = shalt.err (!%p2403_p4)
}
  0x20   : > { %s2490_s25 = smov 128   ;;  %s2491_s5 = smov 8  }
  0x21   : > { %2317 = dma.hbm_to_vmem [thread:$0]  (!%p2592_p0), %s190_s10, 1024, %s192_s12, %s179_s14, %s2490_s25, %s2490_s25, %s2491_s5  }
  0x22   : > { %p199_p13 = scmp.lt.s32.totalorder %s2487_s20, 3 }
  0x24   : > { %p200_p2 = pnand %p2030_p1, %p199_p13 }
  0x25   : > { %s2605_s6 = sand.u32 (!%p200_p2), 1, %s2471_s16  }
  0x26   : > { %203 = sbr.rel (%p200_p2) target bundleno = 544 (0x220), region = 36  ;;  %s2031_s7 = sshll.u32 (!%p200_p2), %s2605_s6, 6 }
  0x27   : > { %s206_s8 = scalar_lea.sflag (!%p200_p2), [#allocation3], %s2605_s6  ;;  %s2611_s9 = scalar_lea.vmem (!%p200_p2), [#allocation2], %s2031_s7 }
  0x2b   : > { %2458 = dma.done.wait (%p2568_p8), %s206_s8, 1024  }
  0x2c   : > { %2460 = vsyncadd (%p2568_p8), %s206_s8, 4294966272  ;;  %v2492_v0 = vmov 0   ;;  %v2035_v1 = vld [vmem:[%s3277_s1 + $0x2] ss:$0 sm:$0xff]  ;;  %v2033_v2 = vld [vmem:[%s3277_s1] ss:$0 sm:$0xff] }
  0x2d   : > { %2378 = vset.pattern.permute.xlu1 %v2492_v0  ;;  %2377 = vset.pattern.permute.xlu0 %v2492_v0  ;;  %v2036_v3 = vld [vmem:[%s3277_s1 + $0x3] ss:$0 sm:$0xff]  ;;  %v2034_v4 = vld [vmem:[%s3277_s1 + $0x1] ss:$0 sm:$0xff]  ;;  %v2069_v5 = vld [vmem:[%s3277_s1 + $0x14] ss:$0 sm:$0xff] }
  0x2e   : > { %349 = vperm.xlu1 %2378, %v2035_v1   ;;  %341 = vperm.xlu0 %2377, %v2033_v2   ;;  %v2037_v6 = vld [vmem:[%s3277_s1 + $0x4] ss:$0 sm:$0xff]  ;;  %v2065_v8 = vld [vmem:[%s3277_s1 + $0x10] ss:$0 sm:$0xff]  ;;  %v2070_v9 = vld [vmem:[%s3277_s1 + $0x15] ss:$0 sm:$0xff] }
  0x2f   : > { %v2101_v7 = vld [vmem:[%s3277_s1 + $0x24] ss:$0 sm:$0xff]  ;;  %v2038_v10 = vld [vmem:[%s3277_s1 + $0x5] ss:$0 sm:$0xff]  ;;  %v2133_v11 = vld [vmem:[%s3277_s1 + $0x34] ss:$0 sm:$0xff] }
  0x30   : > { %v2097_v12 = vld [vmem:[%s3277_s1 + $0x20] ss:$0 sm:$0xff]  ;;  %v2102_v13 = vld [vmem:[%s3277_s1 + $0x25] ss:$0 sm:$0xff]  ;;  %v2066_v14 = vld [vmem:[%s3277_s1 + $0x11] ss:$0 sm:$0xff] }
  0x31   : > { %v2039_v15 = vld [vmem:[%s3277_s1 + $0x6] ss:$0 sm:$0xff]  ;;  %v2129_v16 = vld [vmem:[%s3277_s1 + $0x30] ss:$0 sm:$0xff]  ;;  %v2098_v17 = vld [vmem:[%s3277_s1 + $0x21] ss:$0 sm:$0xff] }
  0x32   : > { %353 = vperm.xlu1 %2378, %v2036_v3   ;;  %345 = vperm.xlu0 %2377, %v2034_v4   ;;  %v2071_v18 = vld [vmem:[%s3277_s1 + $0x16] ss:$0 sm:$0xff]  ;;  %v2149_v19 = vld [vmem:[%s3278_s2 + $0x4] ss:$0 sm:$0xff]  ;;  %v2134_v20 = vld [vmem:[%s3277_s1 + $0x35] ss:$0 sm:$0xff] }
  0x33   : > { %v2162_v21 = vld [vmem:[%s3279_s3 + $0x18] sm:$0xff]  ;;  %v2161_v22 = vld [vmem:[%s3279_s3 + $0x10] sm:$0xff]  ;;  %v2103_v23 = vld [vmem:[%s3277_s1 + $0x26] ss:$0 sm:$0xff]  ;;  %vm1372_vm0 = vcmask 130048   ;;  %vm1911_vm1 = vcmask 523264  }
  0x34   : > { %2246 = vmatprep.subr.mxu0 %v2162_v21  ;;  %v2067_v24 = vld [vmem:[%s3277_s1 + $0x12] ss:$0 sm:$0xff]  ;;  %v2145_v25 = vld [vmem:[%s3278_s2] ss:$0 sm:$0xff]  ;;  %v2130_v26 = vld [vmem:[%s3277_s1 + $0x31] ss:$0 sm:$0xff] }
  0x35   : > { %2247 = vmatpush3.msra.mxu0 %v2162_v21  ;;  %v1368_v27 = vld [vmem:[%s3279_s3 + $0x8] sm:$0xff]  ;;  %v1367_v28 = vld [vmem:[%s3279_s3] sm:$0xff]  ;;  %v2072_v29 = vld [vmem:[%s3277_s1 + $0x17] ss:$0 sm:$0xff]  ;;  %s3203_s22 = scalar_lea.vmem [#allocation5], %s2031_s7  ;;  %s2205_s7 = sshll.u32 %s2479_s18, 10 }
  0x36   : > { %582 = vperm.xlu1 %2378, %v2069_v5   ;;  %357 = vperm.xlu0 %2377, %v2037_v6   ;;  %v2040_v30 = vld [vmem:[%s3277_s1 + $0x7] ss:$0 sm:$0xff]  ;;  %v2135_v31 = vld [vmem:[%s3277_s1 + $0x36] ss:$0 sm:$0xff]  ;;  %v2099_v32 = vld [vmem:[%s3277_s1 + $0x22] ss:$0 sm:$0xff]  ;;  %s3222_s25 = scalar_lea.hbm %s3280_s4, %s2205_s7 }
  0x37   : > { %2248 = vmatprep.subr.mxu0 %v2161_v22  ;;  %2262 = vmatprep.subr.mxu1 %v1368_v27  ;;  %v2068_v33 = vld [vmem:[%s3277_s1 + $0x13] ss:$0 sm:$0xff]  ;;  %v2150_v34 = vld [vmem:[%s3278_s2 + $0x5] ss:$0 sm:$0xff]  ;;  %v2131_v35 = vld [vmem:[%s3277_s1 + $0x32] ss:$0 sm:$0xff] }
  0x38   : > { %2249 = vmatpush3.msra.mxu0 %v2161_v22  ;;  %2263 = vmatpush3.msra.mxu1 %v1368_v27  ;;  %v2104_v36 = vld [vmem:[%s3277_s1 + $0x27] ss:$0 sm:$0xff]  ;;  %v2041_v37 = vld [vmem:[%s3277_s1 + $0x8] ss:$0 sm:$0xff]  ;;  %v2146_v38 = vld [vmem:[%s3278_s2 + $0x1] ss:$0 sm:$0xff] }
  0x39   : > { %2264 = vmatprep.subr.mxu1 %v1367_v28  ;;  %v2100_v39 = vld [vmem:[%s3277_s1 + $0x23] ss:$0 sm:$0xff]  ;;  %v2073_v40 = vld [vmem:[%s3277_s1 + $0x18] ss:$0 sm:$0xff]  ;;  %v2151_v41 = vld [vmem:[%s3278_s2 + $0x6] ss:$0 sm:$0xff] }
  0x3a   : > { %807 = vperm.xlu1 %2378, %v2101_v7   ;;  %566 = vperm.xlu0 %2377, %v2065_v8   ;;  %v2136_v42 = vld [vmem:[%s3277_s1 + $0x37] ss:$0 sm:$0xff]  ;;  %v2077_v43 = vld [vmem:[%s3277_s1 + $0x1c] ss:$0 sm:$0xff]  ;;  %v2045_v44 = vld [vmem:[%s3277_s1 + $0xc] ss:$0 sm:$0xff] }
  0x3b   : > { %2265 = vmatpush3.msra.mxu1 %v1367_v28  ;;  %v2132_v45 = vld [vmem:[%s3277_s1 + $0x33] ss:$0 sm:$0xff]  ;;  %v2105_v46 = vld [vmem:[%s3277_s1 + $0x28] ss:$0 sm:$0xff]  ;;  %v2042_v47 = vld [vmem:[%s3277_s1 + $0x9] ss:$0 sm:$0xff] }
  0x3c   : > { %v2147_v48 = vld [vmem:[%s3278_s2 + $0x2] ss:$0 sm:$0xff]  ;;  %v2109_v49 = vld [vmem:[%s3277_s1 + $0x2c] ss:$0 sm:$0xff]  ;;  %v2074_v50 = vld [vmem:[%s3277_s1 + $0x19] ss:$0 sm:$0xff] }
  0x3d   : > { %v2152_v51 = vld [vmem:[%s3278_s2 + $0x7] ss:$0 sm:$0xff]  ;;  %v2137_v52 = vld [vmem:[%s3277_s1 + $0x38] ss:$0 sm:$0xff]  ;;  %v2078_v53 = vld [vmem:[%s3277_s1 + $0x1d] ss:$0 sm:$0xff] }
  0x3e   : > { %586 = vperm.xlu1 %2378, %v2070_v9   ;;  %361 = vperm.xlu0 %2377, %v2038_v10   ;;  %v2046_v54 = vld [vmem:[%s3277_s1 + $0xd] ss:$0 sm:$0xff]  ;;  %v2141_v55 = vld [vmem:[%s3277_s1 + $0x3c] ss:$0 sm:$0xff]  ;;  %v2106_v56 = vld [vmem:[%s3277_s1 + $0x29] ss:$0 sm:$0xff] }
  0x3f   : > { %v2043_v57 = vld [vmem:[%s3277_s1 + $0xa] ss:$0 sm:$0xff]  ;;  %v2148_v58 = vld [vmem:[%s3278_s2 + $0x3] ss:$0 sm:$0xff]  ;;  %v2110_v59 = vld [vmem:[%s3277_s1 + $0x2d] ss:$0 sm:$0xff] }
  0x40   : > { %v2075_v60 = vld [vmem:[%s3277_s1 + $0x1a] ss:$0 sm:$0xff]  ;;  %v2153_v61 = vld [vmem:[%s3278_s2 + $0x8] ss:$0 sm:$0xff]  ;;  %v2138_v62 = vld [vmem:[%s3277_s1 + $0x39] ss:$0 sm:$0xff] }
  0x41   : > { %v2806_v63 = vld [vmem:[%s3279_s3 + $0x28] sm:$0xff]  ;;  %v2079_v0 = vld [vmem:[%s3277_s1 + $0x1e] ss:$0 sm:$0xff]  ;;  %v2142_v2 = vld [vmem:[%s3277_s1 + $0x3d] ss:$0 sm:$0xff]  ;;  %s1936_s27 = sshll.u32 %s3203_s22, 4  ;;  %s3224_s27 = int_to_ptr.vmem [resolvable:$true] %s1936_s27 }
  0x42   : > { %1032 = vperm.xlu1 %2378, %v2133_v11   ;;  %791 = vperm.xlu0 %2377, %v2097_v12   ;;  %v2047_v1 = vld [vmem:[%s3277_s1 + $0xe] ss:$0 sm:$0xff]  ;;  %v2107_v3 = vld [vmem:[%s3277_s1 + $0x2a] ss:$0 sm:$0xff]  ;;  %v2044_v4 = vld [vmem:[%s3277_s1 + $0xb] ss:$0 sm:$0xff] }
  0x43   : > { %2278 = vmatprep.subr.mxu0 %v2806_v63  ;;  %v2827_v5 = vld [vmem:[%s3279_s3 + $0x38] sm:$0xff]  ;;  %v2157_v6 = vld [vmem:[%s3278_s2 + $0xc] ss:$0 sm:$0xff]  ;;  %v2111_v9 = vld [vmem:[%s3277_s1 + $0x2e] ss:$0 sm:$0xff]  ;;  %s1921_s18 = scalar_lea.sflag [#allocation4], %s2605_s6 }
  0x44   : > { %2294 = vmatprep.subr.mxu1 %v2827_v5  ;;  %v2076_v10 = vld [vmem:[%s3277_s1 + $0x1b] ss:$0 sm:$0xff]  ;;  %v2143_v21 = vld [vmem:[%s3277_s1 + $0x3e] ss:$0 sm:$0xff]  ;;  %v2108_v22 = vld [vmem:[%s3277_s1 + $0x2b] ss:$0 sm:$0xff] }
  0x45   : > { %s2407_s5 = scalar_lea.vmem %s3224_s27, 1024  ;;  %s2493_s8 = smov [#allocation5]  }
  0x46   : > { %811 = vperm.xlu1 %2378, %v2102_v13   ;;  %570 = vperm.xlu0 %2377, %v2066_v14   ;;  %v2154_v13 = vld [vmem:[%s3278_s2 + $0x9] ss:$0 sm:$0xff]  ;;  %v2139_v14 = vld [vmem:[%s3277_s1 + $0x3a] ss:$0 sm:$0xff]  ;;  %p2408_p8 = scmp.ne.s32.totalorder %s3224_s27, %s2407_s5  ;;  %s2411_s10 = sshll.u32 %s2493_s8, 4  ;;  %s2412_s10 = int_to_ptr.vmem [resolvable:$false] %s2411_s10 }
  0x47   : > { %p2414_p1 = scmp.lt.s32.totalorder %s3224_s27, %s2412_s10 }
  0x48   : > { %p2409_p12 = pnand %p2408_p8, %p2572_p9 }
  0x4a   : > { %365 = vperm.xlu1 %2378, %v2039_v15   ;;  %1016 = vperm.xlu0 %2377, %v2129_v16   ;;  %p2410_p0 = pneg %p2409_p12 }
  0x4e   : > { %795 = vperm.xlu1 %2378, %v2098_v17   ;;  %590 = vperm.xlu0 %2377, %v2071_v18   ;;  %v2080_v17 = vld [vmem:[%s3277_s1 + $0x1f] ss:$0 sm:$0xff]  ;;  %v2048_v18 = vld [vmem:[%s3277_s1 + $0xf] ss:$0 sm:$0xff] }
  0x52   : > { %1256 = vperm.xlu1 %2378, %v2149_v19   ;;  %1036 = vperm.xlu0 %2377, %v2134_v20  }
  0x56   : > { %815 = vperm.xlu1 %2378, %v2103_v23   ;;  %574 = vperm.xlu0 %2377, %v2067_v24  }
  0x5a   : > { %1240 = vperm.xlu1 %2378, %v2145_v25   ;;  %1020 = vperm.xlu0 %2377, %v2130_v26   ;;  %v2112_v25 = vld [vmem:[%s3277_s1 + $0x2f] ss:$0 sm:$0xff]  ;;  %v2158_v26 = vld [vmem:[%s3278_s2 + $0xd] ss:$0 sm:$0xff] }
  0x5e   : > { %594 = vperm.xlu1 %2378, %v2072_v29   ;;  %369 = vperm.xlu0 %2377, %v2040_v30   ;;  %v2155_v29 = vld [vmem:[%s3278_s2 + $0xa] ss:$0 sm:$0xff]  ;;  %v2140_v30 = vld [vmem:[%s3277_s1 + $0x3b] ss:$0 sm:$0xff] }
  0x62   : > { %1040 = vperm.xlu1 %2378, %v2135_v31   ;;  %799 = vperm.xlu0 %2377, %v2099_v32   ;;  %v2882_v31 = vld [vmem:[%s2611_s9 + $0x10] sm:$0xff]  ;;  %v2885_v32 = vld [vmem:[%s2611_s9 + $0x18] sm:$0xff] }
  0x66   : > { %578 = vperm.xlu1 %2378, %v2068_v33   ;;  %1260 = vperm.xlu0 %2377, %v2150_v34  }
  0x6a   : > { %1024 = vperm.xlu1 %2378, %v2131_v35   ;;  %819 = vperm.xlu0 %2377, %v2104_v36   ;;  %v2892_v35 = vld [vmem:[%s2611_s9] sm:$0xff]  ;;  %v2895_v36 = vld [vmem:[%s2611_s9 + $0x8] sm:$0xff] }
  0x6e   : > { %373 = vperm.xlu1 %2378, %v2041_v37   ;;  %1244 = vperm.xlu0 %2377, %v2146_v38   ;;  %v2898_v37 = vld [vmem:[%s2611_s9 + $0x20] sm:$0xff]  ;;  %v2901_v38 = vld [vmem:[%s2611_s9 + $0x28] sm:$0xff] }
  0x72   : > { %803 = vperm.xlu1 %2378, %v2100_v39   ;;  %598 = vperm.xlu0 %2377, %v2073_v40   ;;  %v2159_v39 = vld [vmem:[%s3278_s2 + $0xe] ss:$0 sm:$0xff] }
  0x76   : > { %1264 = vperm.xlu1 %2378, %v2151_v41   ;;  %1044 = vperm.xlu0 %2377, %v2136_v42  }
  0x7a   : > { %614 = vperm.xlu1 %2378, %v2077_v43   ;;  %389 = vperm.xlu0 %2377, %v2045_v44   ;;  %v2144_v44 = vld [vmem:[%s3277_s1 + $0x3f] ss:$0 sm:$0xff] }
  0x7e   : > { %1028 = vperm.xlu1 %2378, %v2132_v45   ;;  %823 = vperm.xlu0 %2377, %v2105_v46   ;;  %v2914_v45 = vld [vmem:[%s2611_s9 + $0x30] sm:$0xff]  ;;  %v2917_v46 = vld [vmem:[%s2611_s9 + $0x38] sm:$0xff]  ;;  %s2413_s9 = scalar_lea.vmem %s2412_s10, 2048 }
  0x7f   : > { %p2415_p3 = scmp.lt.s32.totalorder %s2413_s9, %s2407_s5 }
  0x81   : > { %p2416_p5 = por %p2415_p3, %p2414_p1 }
  0x82   : > { %377 = vperm.xlu1 %2378, %v2042_v47   ;;  %1248 = vperm.xlu0 %2377, %v2147_v48  }
  0x83   : > { %p2417_p6 = pnand %p2416_p5, %p2410_p0 }
  0x86   : > { %839 = vperm.xlu1 %2378, %v2109_v49   ;;  %602 = vperm.xlu0 %2377, %v2074_v50  }
  0x8a   : > { %1268 = vperm.xlu1 %2378, %v2152_v51   ;;  %1048 = vperm.xlu0 %2377, %v2137_v52   ;;  %v2160_v51 = vld [vmem:[%s3278_s2 + $0xf] ss:$0 sm:$0xff] }
  0x8e   : > { %618 = vperm.xlu1 %2378, %v2078_v53   ;;  %393 = vperm.xlu0 %2377, %v2046_v54  }
  0x92   : > { %1064 = vperm.xlu1 %2378, %v2141_v55   ;;  %827 = vperm.xlu0 %2377, %v2106_v56   ;;  %v2156_v56 = vld [vmem:[%s3278_s2 + $0xb] ss:$0 sm:$0xff] }
  0x96   : > { %381 = vperm.xlu1 %2378, %v2043_v57   ;;  %1252 = vperm.xlu0 %2377, %v2148_v58  }
  0x9a   : > { %843 = vperm.xlu1 %2378, %v2110_v59   ;;  %606 = vperm.xlu0 %2377, %v2075_v60  }
  0x9e   : > { %1272 = vperm.xlu1 %2378, %v2153_v61   ;;  %1052 = vperm.xlu0 %2377, %v2138_v62  }
  0xa2   : > { %622 = vperm.xlu1 %2378, %v2079_v0   ;;  %397 = vperm.xlu0 %2377, %v2047_v1  }
  0xa6   : > { %1068 = vperm.xlu1 %2378, %v2142_v2   ;;  %831 = vperm.xlu0 %2377, %v2107_v3  }
  0xa9   : > { %v2833_v7 = vpop.permute.xlu1 %349  ;;  %v2835_v8 = vpop.permute.xlu0 %341 }
  0xaa   : > { %385 = vperm.xlu1 %2378, %v2044_v4   ;;  %1288 = vperm.xlu0 %2377, %v2157_v6   ;;  %v404_v2 = vmul.f32 %v2835_v8, %v2892_v35  ;;  %v405_v3 = vmul.f32 %v2835_v8, %v2895_v36 }
  0xad   : > { %v2843_v11 = vpop.permute.xlu1 %353  ;;  %v2845_v12 = vpop.permute.xlu0 %345 }
  0xae   : > { %847 = vperm.xlu1 %2378, %v2111_v9   ;;  %610 = vperm.xlu0 %2377, %v2076_v10  }
  0xb1   : > { %v583_v15 = vpop.permute.xlu1 %582  ;;  %v358_v16 = vpop.permute.xlu0 %357 }
  0xb2   : > { %1276 = vperm.xlu1 %2378, %v2154_v13   ;;  %1056 = vperm.xlu0 %2377, %v2139_v14   ;;  %v637_v40 = vmul.f32 %v583_v15, %v2882_v31  ;;  %v638_v41 = vmul.f32 %v583_v15, %v2885_v32  ;;  %v412_v42 = vmul.f32 %v358_v16, %v2892_v35 }
  0xb3   : > { %v413_v43 = vmul.f32 %v358_v16, %v2895_v36 }
  0xb4   : > { %v669_v52 = vadd.f32 %v637_v40, %v412_v42 }
  0xb5   : > { %v808_v19 = vpop.permute.xlu1 %807  ;;  %v567_v20 = vpop.permute.xlu0 %566  ;;  %v670_v53 = vadd.f32 %v638_v41, %v413_v43 }
  0xb6   : > { %626 = vperm.xlu1 %2378, %v2080_v17   ;;  %401 = vperm.xlu0 %2377, %v2048_v18   ;;  %v862_v49 = vmul.f32 %v808_v19, %v2898_v37  ;;  %v863_v50 = vmul.f32 %v808_v19, %v2901_v38  ;;  %v629_v61 = vmul.f32 %v567_v20, %v2882_v31 }
  0xb7   : > { %v630_v62 = vmul.f32 %v567_v20, %v2885_v32 }
  0xb8   : > { %v894_v59 = vadd.f32 %v862_v49, %v669_v52  ;;  %v895_v60 = vadd.f32 %v863_v50, %v670_v53  ;;  %v661_v15 = vadd.f32 %v629_v61, %v404_v2  ;;  %v406_v2 = vmul.f32 %v2845_v12, %v2892_v35 }
  0xb9   : > { %v2865_v23 = vpop.permute.xlu1 %586  ;;  %v2867_v24 = vpop.permute.xlu0 %361  ;;  %v662_v16 = vadd.f32 %v630_v62, %v405_v3 }
  0xba   : > { %1072 = vperm.xlu1 %2378, %v2143_v21   ;;  %835 = vperm.xlu0 %2377, %v2108_v22   ;;  %v639_v41 = vmul.f32 %v2865_v23, %v2882_v31  ;;  %v640_v42 = vmul.f32 %v2865_v23, %v2885_v32  ;;  %v414_v43 = vmul.f32 %v2867_v24, %v2892_v35  ;;  %v2189_v23 = vld [vmem:[%s3279_s3 + $0x30] sm:$0xff] }
  0xbd   : > { %v1033_v27 = vpop.permute.xlu1 %1032  ;;  %v792_v28 = vpop.permute.xlu0 %791 }
  0xbe   : > { %851 = vperm.xlu1 %2378, %v2112_v25   ;;  %1292 = vperm.xlu0 %2377, %v2158_v26   ;;  %v1087_v54 = vmul.f32 %v1033_v27, %v2914_v45  ;;  %v1088_v55 = vmul.f32 %v1033_v27, %v2917_v46  ;;  %v854_v9 = vmul.f32 %v792_v28, %v2898_v37  ;;  %v2179_v26 = vld [vmem:[%s3279_s3 + $0x20] sm:$0xff] }
  0xbf   : > { %v855_v10 = vmul.f32 %v792_v28, %v2901_v38 }
  0xc0   : > { %v1119_v0 = vadd.f32 %v1087_v54, %v894_v59  ;;  %v1120_v1 = vadd.f32 %v1088_v55, %v895_v60  ;;  %v886_v22 = vadd.f32 %v854_v9, %v661_v15 }
  0xc1   : > { %v2887_v33 = vpop.permute.xlu1 %811  ;;  %v2889_v34 = vpop.permute.xlu0 %570  ;;  %v887_v25 = vadd.f32 %v855_v10, %v662_v16 }
  0xc2   : > { %1280 = vperm.xlu1 %2378, %v2155_v29   ;;  %1060 = vperm.xlu0 %2377, %v2140_v30   ;;  %v865_v52 = vmul.f32 %v2887_v33, %v2901_v38  ;;  %v631_v61 = vmul.f32 %v2889_v34, %v2882_v31  ;;  %v632_v62 = vmul.f32 %v2889_v34, %v2885_v32 }
  0xc4   : > { %v663_v34 = vadd.f32 %v631_v61, %v406_v2 }
  0xc5   : > { %v2919_v47 = vpop.permute.xlu1 %365  ;;  %v1017_v48 = vpop.permute.xlu0 %1016 }
  0xc6   : > { %1296 = vperm.xlu1 %2378, %v2159_v39   ;;  %1076 = vperm.xlu0 %2377, %v2144_v44   ;;  %v1079_v17 = vmul.f32 %v1017_v48, %v2914_v45  ;;  %v1080_v18 = vmul.f32 %v1017_v48, %v2917_v46  ;;  %v415_v44 = vmul.f32 %v2867_v24, %v2895_v36 }
  0xc7   : > { %v671_v24 = vadd.f32 %v639_v41, %v414_v43 }
  0xc8   : > { %v1111_v27 = vadd.f32 %v1079_v17, %v886_v22  ;;  %v1112_v28 = vadd.f32 %v1080_v18, %v887_v25  ;;  %v672_v53 = vadd.f32 %v640_v42, %v415_v44 }
  0xc9   : > { %v2931_v57 = vpop.permute.xlu1 %795  ;;  %v2933_v58 = vpop.permute.xlu0 %590 }
  0xca   : > { %1300 = vperm.xlu1 %2378, %v2160_v51   ;;  %1284 = vperm.xlu0 %2377, %v2156_v56   ;;  %v864_v51 = vmul.f32 %v2887_v33, %v2898_v37  ;;  %v897_v60 = vadd.f32 %v865_v52, %v672_v53  ;;  %v857_v9 = vmul.f32 %v2931_v57, %v2901_v38 }
  0xcb   : > { %v642_v25 = vmul.f32 %v2933_v58, %v2885_v32 }
  0xcc   : > { %v896_v33 = vadd.f32 %v864_v51, %v671_v24 }
  0xcd   : > { %v1257_v4 = vpop.permute.xlu1 %1256  ;;  %v1037_v6 = vpop.permute.xlu0 %1036 }
  0xce   : > { %v1311_v13 = vadd.f32 %v1257_v4, %v1119_v0  ;;  %v1312_v14 = vadd.f32 %v1257_v4, %v1120_v1  ;;  %v1089_v54 = vmul.f32 %v1037_v6, %v2914_v45  ;;  %v1090_v55 = vmul.f32 %v1037_v6, %v2917_v46 }
  0xcf   : > { %v856_v6 = vmul.f32 %v2931_v57, %v2898_v37  ;;  %v641_v57 = vmul.f32 %v2933_v58, %v2882_v31 }
  0xd0   : > { %v1344_v19 = vmax.f32 %v1312_v14, 0.0  ;;  %v1343_v20 = vmax.f32 %v1311_v13, 0.0  ;;  %v1121_v0 = vadd.f32 %v1089_v54, %v896_v33  ;;  %v1122_v1 = vadd.f32 %v1090_v55, %v897_v60 }
  0xd1   : > { %v2945_v21 = vpop.permute.xlu1 %815  ;;  %v2947_v8 = vpop.permute.xlu0 %574 }
  0xd2   : > { %2250 = vmatprep.mubr.msk.f32.mxu0 %vm1372_vm0, %v1343_v20  ;;  %v888_v20 = vadd.f32 %v856_v6, %v663_v34  ;;  %v867_v41 = vmul.f32 %v2945_v21, %v2901_v38  ;;  %v409_v6 = vmul.f32 %v2833_v7, %v2895_v36 }
  0xd3   : > { %2251 = vmatmul.mubr.msk.f32.vlgmr.msra.gmra.mxu0 %vm1372_vm0, %v1344_v19 }
  0xd4   : > { %2279 = vmatpush3.msra.mxu0 %v2806_v63 }
  0xd5   : > { %v1241_v29 = vpop.permute.xlu1 %1240  ;;  %v1021_v30 = vpop.permute.xlu0 %1020  ;;  %2280 = vmatprep.subr.mxu0 %v2179_v26 }
  0xd6   : > { %v1303_v39 = vadd.f32 %v1241_v29, %v1111_v27  ;;  %v1304_v40 = vadd.f32 %v1241_v29, %v1112_v28  ;;  %2281 = vmatpush3.msra.mxu0 %v2179_v26  ;;  %v1081_v15 = vmul.f32 %v1021_v30, %v2914_v45  ;;  %v1082_v16 = vmul.f32 %v1021_v30, %v2917_v46 }
  0xd7   : > { %v416_v28 = vmul.f32 %v2919_v47, %v2892_v35  ;;  %v417_v29 = vmul.f32 %v2919_v47, %v2895_v36 }
  0xd8   : > { %v1336_v48 = vmax.f32 %v1304_v40, 0.0  ;;  %v1335_v63 = vmax.f32 %v1303_v39, 0.0  ;;  %v1113_v26 = vadd.f32 %v1081_v15, %v888_v20  ;;  %v866_v40 = vmul.f32 %v2945_v21, %v2898_v37 }
  0xd9   : > { %v2963_v49 = vpop.permute.xlu1 %594  ;;  %v2965_v50 = vpop.permute.xlu0 %369  ;;  %v673_v43 = vadd.f32 %v641_v57, %v416_v28  ;;  %v674_v44 = vadd.f32 %v642_v25, %v417_v29 }
  0xda   : > { %2266 = vmatprep.mubr.msk.f32.mxu1 %vm1372_vm0, %v1335_v63  ;;  %v418_v20 = vmul.f32 %v2965_v50, %v2892_v35 }
  0xdb   : > { %2267 = vmatmul.mubr.msk.f32.vlgmr.msra.gmra.mxu1 %vm1372_vm0, %v1336_v48  ;;  %v898_v24 = vadd.f32 %v866_v40, %v673_v43  ;;  %v899_v53 = vadd.f32 %v867_v41, %v674_v44 }
  0xdc   : > { %2295 = vmatpush3.msra.mxu1 %v2827_v5  ;;  %v407_v5 = vmul.f32 %v2845_v12, %v2895_v36 }
  0xdd   : > { %v1041_v56 = vpop.permute.xlu1 %1040  ;;  %v2979_v59 = vpop.permute.xlu0 %799  ;;  %2296 = vmatprep.subr.mxu1 %v2189_v23 }
  0xde   : > { %2297 = vmatpush3.msra.mxu1 %v2189_v23  ;;  %v664_v14 = vadd.f32 %v632_v62, %v407_v5  ;;  %v1091_v48 = vmul.f32 %v1041_v56, %v2914_v45  ;;  %v1092_v63 = vmul.f32 %v1041_v56, %v2917_v46  ;;  %v633_v56 = vmul.f32 %v2947_v8, %v2882_v31 }
  0xdf   : > { %v634_v62 = vmul.f32 %v2947_v8, %v2885_v32 }
  0xe0   : > { %v889_v22 = vadd.f32 %v857_v9, %v664_v14  ;;  %v1123_v21 = vadd.f32 %v1091_v48, %v898_v24  ;;  %v1124_v54 = vadd.f32 %v1092_v63, %v899_v53  ;;  %v858_v9 = vmul.f32 %v2979_v59, %v2898_v37 }
  0xe1   : > { %v2989_v3 = vpop.permute.xlu1 %578  ;;  %v1261_v4 = vpop.permute.xlu0 %1260 }
  0xe2   : > { %v1313_v10 = vadd.f32 %v1261_v4, %v1121_v0  ;;  %v1314_v13 = vadd.f32 %v1261_v4, %v1122_v1  ;;  %v1114_v27 = vadd.f32 %v1082_v16, %v889_v22  ;;  %v408_v4 = vmul.f32 %v2833_v7, %v2892_v35 }
  0xe3   : > { %v419_v22 = vmul.f32 %v2965_v50, %v2895_v36 }
  0xe4   : > { %v1345_v17 = vmax.f32 %v1313_v10, 0.0  ;;  %v1346_v18 = vmax.f32 %v1314_v13, 0.0  ;;  %v859_v10 = vmul.f32 %v2979_v59, %v2901_v38  ;;  %v665_v8 = vadd.f32 %v633_v56, %v408_v4 }
  0xe5   : > { %v1025_v12 = vpop.permute.xlu1 %1024  ;;  %v2997_v19 = vpop.permute.xlu0 %819  ;;  %v666_v13 = vadd.f32 %v634_v62, %v409_v6  ;;  %v644_v59 = vmul.f32 %v2963_v49, %v2885_v32  ;;  %v410_v62 = vmul.f32 %v2843_v11, %v2892_v35 }
  0xe6   : > { %2253 = vmatprep.mubr.msk.f32.mxu0 %vm1372_vm0, %v1345_v17  ;;  %v1083_v34 = vmul.f32 %v1025_v12, %v2914_v45  ;;  %v1084_v14 = vmul.f32 %v1025_v12, %v2917_v46  ;;  %v890_v17 = vadd.f32 %v858_v9, %v665_v8  ;;  %v869_v28 = vmul.f32 %v2997_v19, %v2901_v38 }
  0xe7   : > { %2254 = vmatmul.mubr.msk.f32.gmra.mxu0 %vm1372_vm0, %v1346_v18  ;;  %v891_v7 = vadd.f32 %v859_v10, %v666_v13  ;;  %v643_v18 = vmul.f32 %v2963_v49, %v2882_v31  ;;  %v676_v40 = vadd.f32 %v644_v59, %v419_v22 }
  0xe8   : > { %v1115_v57 = vadd.f32 %v1083_v34, %v890_v17 }
  0xe9   : > { %v3009_v30 = vpop.permute.xlu1 %373  ;;  %v1245_v39 = vpop.permute.xlu0 %1244  ;;  %v1116_v25 = vadd.f32 %v1084_v14, %v891_v7  ;;  %v675_v49 = vadd.f32 %v643_v18, %v418_v20  ;;  %v901_v63 = vadd.f32 %v869_v28, %v676_v40 }
  0xea   : > { %v1305_v58 = vadd.f32 %v1245_v39, %v1113_v26  ;;  %v1306_v42 = vadd.f32 %v1245_v39, %v1114_v27  ;;  %v868_v27 = vmul.f32 %v2997_v19, %v2898_v37  ;;  %v420_v18 = vmul.f32 %v3009_v30, %v2892_v35 }
  0xeb   : > { %v421_v59 = vmul.f32 %v3009_v30, %v2895_v36 }
  0xec   : > { %v1337_v51 = vmax.f32 %v1305_v58, 0.0  ;;  %v1338_v52 = vmax.f32 %v1306_v42, 0.0  ;;  %v900_v48 = vadd.f32 %v868_v27, %v675_v49 }
  0xed   : > { %v3017_v47 = vpop.permute.xlu1 %803  ;;  %v3019_v23 = vpop.permute.xlu0 %598 }
  0xee   : > { %2269 = vmatprep.mubr.msk.f32.mxu1 %vm1372_vm0, %v1337_v51  ;;  %v861_v4 = vmul.f32 %v3017_v47, %v2901_v38  ;;  %v645_v14 = vmul.f32 %v3019_v23, %v2882_v31 }
  0xef   : > { %2270 = vmatmul.mubr.msk.f32.gmra.mxu1 %vm1372_vm0, %v1338_v52 }
  0xf0   : > { %v677_v27 = vadd.f32 %v645_v14, %v420_v18 }
  0xf1   : > { %v1265_v55 = vpop.permute.xlu1 %1264  ;;  %v1045_v33 = vpop.permute.xlu0 %1044 }
  0xf2   : > { %v1315_v60 = vadd.f32 %v1265_v55, %v1123_v21  ;;  %v1316_v61 = vadd.f32 %v1265_v55, %v1124_v54  ;;  %v1093_v41 = vmul.f32 %v1045_v33, %v2914_v45  ;;  %v1094_v58 = vmul.f32 %v1045_v33, %v2917_v46 }
  0xf3   : > { %v635_v54 = vmul.f32 %v2989_v3, %v2882_v31  ;;  %v636_v55 = vmul.f32 %v2989_v3, %v2885_v32 }
  0xf4   : > { %v1347_v0 = vmax.f32 %v1315_v60, 0.0  ;;  %v1348_v1 = vmax.f32 %v1316_v61, 0.0  ;;  %v1125_v19 = vadd.f32 %v1093_v41, %v900_v48  ;;  %v1126_v51 = vadd.f32 %v1094_v58, %v901_v63 }
  0xf5   : > { %v3027_v2 = vpop.permute.xlu1 %614  ;;  %v3029_v5 = vpop.permute.xlu0 %389  ;;  %v667_v3 = vadd.f32 %v635_v54, %v410_v62 }
  0xf6   : > { %2256 = vmatprep.mubr.msk.f32.mxu0 %vm1372_vm0, %v1347_v0  ;;  %v411_v0 = vmul.f32 %v2843_v11, %v2895_v36  ;;  %v429_v54 = vmul.f32 %v3029_v5, %v2895_v36 }
  0xf7   : > { %2257 = vmatmul.mubr.msk.f32.gmra.mxu0 %vm1372_vm0, %v1348_v1  ;;  %v860_v1 = vmul.f32 %v3017_v47, %v2898_v37  ;;  %v646_v47 = vmul.f32 %v3019_v23, %v2885_v32 }
  0xf8   : > { %v668_v6 = vadd.f32 %v636_v55, %v411_v0 }
  0xf9   : > { %v1029_v15 = vpop.permute.xlu1 %1028  ;;  %v824_v16 = vpop.permute.xlu0 %823  ;;  %v892_v34 = vadd.f32 %v860_v1, %v667_v3  ;;  %v678_v28 = vadd.f32 %v646_v47, %v421_v59 }
  0xfa   : > { %v1085_v9 = vmul.f32 %v1029_v15, %v2914_v45  ;;  %v1086_v10 = vmul.f32 %v1029_v15, %v2917_v46  ;;  %v893_v11 = vadd.f32 %v861_v4, %v668_v6  ;;  %v870_v22 = vmul.f32 %v824_v16, %v2898_v37 }
  0xfc   : > { %v1117_v17 = vadd.f32 %v1085_v9, %v892_v34  ;;  %v1118_v7 = vadd.f32 %v1086_v10, %v893_v11  ;;  %v902_v41 = vadd.f32 %v870_v22, %v677_v27 }
  0xfd   : > { %v3051_v26 = vpop.permute.xlu1 %377  ;;  %v1249_v12 = vpop.permute.xlu0 %1248 }
  0xfe   : > { %v1307_v29 = vadd.f32 %v1249_v12, %v1115_v57  ;;  %v1308_v39 = vadd.f32 %v1249_v12, %v1116_v25  ;;  %v871_v57 = vmul.f32 %v824_v16, %v2901_v38  ;;  %v422_v47 = vmul.f32 %v3051_v26, %v2892_v35 }
 0x100   : > { %v1339_v50 = vmax.f32 %v1307_v29, 0.0  ;;  %v1340_v42 = vmax.f32 %v1308_v39, 0.0  ;;  %v903_v58 = vadd.f32 %v871_v57, %v678_v28 }
 0x101   : > { %v3059_v43 = vpop.permute.xlu1 %839  ;;  %v3061_v44 = vpop.permute.xlu0 %602 }
 0x102   : > { %2272 = vmatprep.mubr.msk.f32.mxu1 %vm1372_vm0, %v1339_v50  ;;  %v879_v62 = vmul.f32 %v3059_v43, %v2901_v38  ;;  %v647_v10 = vmul.f32 %v3061_v44, %v2882_v31  ;;  %v648_v34 = vmul.f32 %v3061_v44, %v2885_v32 }
 0x103   : > { %2273 = vmatmul.mubr.msk.f32.gmra.mxu1 %vm1372_vm0, %v1340_v42 }
 0x104   : > { %v679_v22 = vadd.f32 %v647_v10, %v422_v47 }
 0x105   : > { %v1269_v52 = vpop.permute.xlu1 %1268  ;;  %v1049_v24 = vpop.permute.xlu0 %1048 }
 0x106   : > { %v1317_v53 = vadd.f32 %v1269_v52, %v1125_v19  ;;  %v1318_v21 = vadd.f32 %v1269_v52, %v1126_v51  ;;  %v1095_v23 = vmul.f32 %v1049_v24, %v2914_v45  ;;  %v1096_v29 = vmul.f32 %v1049_v24, %v2917_v46 }
 0x107   : > { %v653_v24 = vmul.f32 %v3027_v2, %v2882_v31 }
 0x108   : > { %v1349_v33 = vmax.f32 %v1317_v53, 0.0  ;;  %v1350_v60 = vmax.f32 %v1318_v21, 0.0  ;;  %v1127_v16 = vadd.f32 %v1095_v23, %v902_v41  ;;  %v1128_v50 = vadd.f32 %v1096_v29, %v903_v58 }
 0x109   : > { %v3069_v61 = vpop.permute.xlu1 %618  ;;  %v3071_v56 = vpop.permute.xlu0 %393  ;;  %v654_v53 = vmul.f32 %v3027_v2, %v2885_v32  ;;  %v428_v21 = vmul.f32 %v3029_v5, %v2892_v35 }
 0x10a   : > { %2259 = vmatprep.mubr.msk.f32.mxu0 %vm1372_vm0, %v1349_v33 }
 0x10b   : > { %2260 = vmatmul.mubr.msk.f32.gmra.mxu0 %vm1372_vm0, %v1350_v60  ;;  %v878_v60 = vmul.f32 %v3059_v43, %v2898_v37  ;;  %v685_v0 = vadd.f32 %v653_v24, %v428_v21  ;;  %v686_v2 = vadd.f32 %v654_v53, %v429_v54 }
 0x10d   : > { %v1065_v8 = vpop.permute.xlu1 %1064  ;;  %v828_v13 = vpop.permute.xlu0 %827  ;;  %v910_v6 = vadd.f32 %v878_v60, %v685_v0  ;;  %v911_v9 = vadd.f32 %v879_v62, %v686_v2 }
 0x10e   : > { %v1103_v1 = vmul.f32 %v1065_v8, %v2914_v45  ;;  %v1104_v4 = vmul.f32 %v1065_v8, %v2917_v46  ;;  %v423_v8 = vmul.f32 %v3051_v26, %v2895_v36 }
 0x110   : > { %v1135_v43 = vadd.f32 %v1103_v1, %v910_v6  ;;  %v1136_v14 = vadd.f32 %v1104_v4, %v911_v9  ;;  %v680_v57 = vadd.f32 %v648_v34, %v423_v8 }
 0x111   : > { %v3093_v20 = vpop.permute.xlu1 %381  ;;  %v1253_v15 = vpop.permute.xlu0 %1252 }
 0x112   : > { %v1309_v25 = vadd.f32 %v1253_v15, %v1117_v17  ;;  %v1310_v12 = vadd.f32 %v1253_v15, %v1118_v7  ;;  %v872_v17 = vmul.f32 %v828_v13, %v2898_v37  ;;  %v873_v7 = vmul.f32 %v828_v13, %v2901_v38 }
 0x113   : > { %v424_v24 = vmul.f32 %v3093_v20, %v2892_v35  ;;  %v425_v53 = vmul.f32 %v3093_v20, %v2895_v36 }
 0x114   : > { %v1341_v39 = vmax.f32 %v1309_v25, 0.0  ;;  %v1342_v49 = vmax.f32 %v1310_v12, 0.0  ;;  %v904_v23 = vadd.f32 %v872_v17, %v679_v22  ;;  %v905_v29 = vadd.f32 %v873_v7, %v680_v57 }
 0x115   : > { %v3099_v40 = vpop.permute.xlu1 %843  ;;  %v3101_v30 = vpop.permute.xlu0 %606 }
 0x116   : > { %2275 = vmatprep.mubr.msk.f32.mxu1 %vm1372_vm0, %v1341_v39  ;;  %v649_v21 = vmul.f32 %v3101_v30, %v2882_v31  ;;  %v650_v54 = vmul.f32 %v3101_v30, %v2885_v32  ;;  %v880_v60 = vmul.f32 %v3099_v40, %v2898_v37 }
 0x117   : > { %2276 = vmatmul.mubr.msk.f32.gmra.mxu1 %vm1372_vm0, %v1342_v49 }
 0x118   : > { %v681_v34 = vadd.f32 %v649_v21, %v424_v24 }
 0x119   : > { %v1273_v42 = vpop.permute.xlu1 %1272  ;;  %v1053_v48 = vpop.permute.xlu0 %1052 }
 0x11a   : > { %v1319_v63 = vadd.f32 %v1273_v42, %v1127_v16  ;;  %v1320_v19 = vadd.f32 %v1273_v42, %v1128_v50  ;;  %v1097_v44 = vmul.f32 %v1053_v48, %v2914_v45  ;;  %v1098_v25 = vmul.f32 %v1053_v48, %v2917_v46 }
 0x11b   : > { %v655_v48 = vmul.f32 %v3069_v61, %v2882_v31 }
 0x11c   : > { %v1351_v51 = vmax.f32 %v1319_v63, 0.0  ;;  %v1352_v52 = vmax.f32 %v1320_v19, 0.0  ;;  %v1129_v26 = vadd.f32 %v1097_v44, %v904_v23  ;;  %v1130_v13 = vadd.f32 %v1098_v25, %v905_v29 }
 0x11d   : > { %v623_v55 = vpop.permute.xlu1 %622  ;;  %v398_v33 = vpop.permute.xlu0 %397  ;;  %v656_v63 = vmul.f32 %v3069_v61, %v2885_v32  ;;  %v430_v19 = vmul.f32 %v3071_v56, %v2892_v35 }
 0x11e   : > { %2282 = vmatprep.mubr.msk.f32.mxu0 %vm1372_vm0, %v1351_v51  ;;  %v431_v51 = vmul.f32 %v3071_v56, %v2895_v36  ;;  %v881_v56 = vmul.f32 %v3099_v40, %v2901_v38  ;;  %v657_v62 = vmul.f32 %v623_v55, %v2882_v31  ;;  %v658_v0 = vmul.f32 %v623_v55, %v2885_v32 }
 0x11f   : > { %2283 = vmatmul.mubr.msk.f32.vlgmr.msra.gmra.mxu0 %vm1372_vm0, %v1352_v52  ;;  %v432_v20 = vmul.f32 %v398_v33, %v2892_v35  ;;  %v433_v2 = vmul.f32 %v398_v33, %v2895_v36  ;;  %v687_v4 = vadd.f32 %v655_v48, %v430_v19 }
 0x120   : > { %v688_v6 = vadd.f32 %v656_v63, %v431_v51 }
 0x121   : > { %v1069_v3 = vpop.permute.xlu1 %1068  ;;  %v832_v5 = vpop.permute.xlu0 %831  ;;  %v912_v8 = vadd.f32 %v880_v60, %v687_v4  ;;  %v689_v7 = vadd.f32 %v657_v62, %v432_v20 }
 0x122   : > { %v874_v30 = vmul.f32 %v832_v5, %v2898_v37  ;;  %v875_v1 = vmul.f32 %v832_v5, %v2901_v38  ;;  %v1105_v9 = vmul.f32 %v1069_v3, %v2914_v45  ;;  %v1106_v40 = vmul.f32 %v1069_v3, %v2917_v46 }
 0x123   : > { %v913_v33 = vadd.f32 %v881_v56, %v688_v6 }
 0x124   : > { %v1137_v44 = vadd.f32 %v1105_v9, %v912_v8 }
 0x125   : > { %v3125_v11 = vpop.permute.xlu1 %385  ;;  %v1289_v18 = vpop.permute.xlu0 %1288  ;;  %v1138_v25 = vadd.f32 %v1106_v40, %v913_v33 }
 0x126   : > { %v1327_v59 = vadd.f32 %v1289_v18, %v1135_v43  ;;  %v1328_v15 = vadd.f32 %v1289_v18, %v1136_v14  ;;  %v682_v43 = vadd.f32 %v650_v54, %v425_v53  ;;  %v690_v18 = vadd.f32 %v658_v0, %v433_v2 }
 0x127   : > { %v426_v3 = vmul.f32 %v3125_v11, %v2892_v35  ;;  %v427_v22 = vmul.f32 %v3125_v11, %v2895_v36 }
 0x128   : > { %v1359_v12 = vmax.f32 %v1327_v59, 0.0  ;;  %v1360_v27 = vmax.f32 %v1328_v15, 0.0  ;;  %v906_v59 = vadd.f32 %v874_v30, %v681_v34  ;;  %v907_v15 = vadd.f32 %v875_v1, %v682_v43 }
 0x129   : > { %v848_v28 = vpop.permute.xlu1 %847  ;;  %v611_v39 = vpop.permute.xlu0 %610 }
 0x12a   : > { %2298 = vmatprep.mubr.msk.f32.mxu1 %vm1372_vm0, %v1359_v12  ;;  %v882_v55 = vmul.f32 %v848_v28, %v2898_v37  ;;  %v883_v14 = vmul.f32 %v848_v28, %v2901_v38  ;;  %v651_v28 = vmul.f32 %v611_v39, %v2882_v31  ;;  %v652_v23 = vmul.f32 %v611_v39, %v2885_v32 }
 0x12b   : > { %2299 = vmatmul.mubr.msk.f32.vlgmr.msra.gmra.mxu1 %vm1372_vm0, %v1360_v27 }
 0x12c   : > { %v914_v12 = vadd.f32 %v882_v55, %v689_v7  ;;  %v915_v27 = vadd.f32 %v883_v14, %v690_v18  ;;  %v683_v54 = vadd.f32 %v651_v28, %v426_v3 }
 0x12d   : > { %v1277_v49 = vpop.permute.xlu1 %1276  ;;  %v1057_v16 = vpop.permute.xlu0 %1056 }
 0x12e   : > { %v1321_v41 = vadd.f32 %v1277_v49, %v1129_v26  ;;  %v1322_v58 = vadd.f32 %v1277_v49, %v1130_v13  ;;  %v1099_v17 = vmul.f32 %v1057_v16, %v2914_v45  ;;  %v1100_v5 = vmul.f32 %v1057_v16, %v2917_v46 }
 0x130   : > { %v1353_v50 = vmax.f32 %v1321_v41, 0.0  ;;  %v1354_v42 = vmax.f32 %v1322_v58, 0.0  ;;  %v1131_v49 = vadd.f32 %v1099_v17, %v906_v59  ;;  %v1132_v41 = vadd.f32 %v1100_v5, %v907_v15 }
 0x131   : > { %v627_v52 = vpop.permute.xlu1 %626  ;;  %v402_v61 = vpop.permute.xlu0 %401 }
 0x132   : > { %2285 = vmatprep.mubr.msk.f32.mxu0 %vm1372_vm0, %v1353_v50  ;;  %v659_v58 = vmul.f32 %v627_v52, %v2882_v31  ;;  %v660_v16 = vmul.f32 %v627_v52, %v2885_v32  ;;  %v435_v48 = vmul.f32 %v402_v61, %v2895_v36  ;;  %v684_v32 = vadd.f32 %v652_v23, %v427_v22 }
 0x133   : > { %2286 = vmatmul.mubr.msk.f32.gmra.mxu0 %vm1372_vm0, %v1354_v42  ;;  %v434_v42 = vmul.f32 %v402_v61, %v2892_v35 }
 0x134   : > { %v692_v0 = vadd.f32 %v660_v16, %v435_v48 }
 0x135   : > { %v1073_v10 = vpop.permute.xlu1 %1072  ;;  %v836_v47 = vpop.permute.xlu0 %835  ;;  %v691_v62 = vadd.f32 %v659_v58, %v434_v42 }
 0x136   : > { %v1107_v11 = vmul.f32 %v1073_v10, %v2914_v45  ;;  %v1108_v50 = vmul.f32 %v1073_v10, %v2917_v46  ;;  %v876_v51 = vmul.f32 %v836_v47, %v2898_v37  ;;  %v877_v24 = vmul.f32 %v836_v47, %v2901_v38 }
 0x138   : > { %v1139_v61 = vadd.f32 %v1107_v11, %v914_v12  ;;  %v1140_v56 = vadd.f32 %v1108_v50, %v915_v27  ;;  %v908_v1 = vadd.f32 %v876_v51, %v683_v54  ;;  %v909_v4 = vadd.f32 %v877_v24, %v684_v32 }
 0x139   : > { %v852_v57 = vpop.permute.xlu1 %851  ;;  %v1293_v29 = vpop.permute.xlu0 %1292 }
 0x13a   : > { %v1329_v26 = vadd.f32 %v1293_v29, %v1137_v44  ;;  %v1330_v13 = vadd.f32 %v1293_v29, %v1138_v25  ;;  %v884_v52 = vmul.f32 %v852_v57, %v2898_v37  ;;  %v885_v60 = vmul.f32 %v852_v57, %v2901_v38 }
 0x13c   : > { %v1361_v63 = vmax.f32 %v1329_v26, 0.0  ;;  %v1362_v19 = vmax.f32 %v1330_v13, 0.0  ;;  %v916_v9 = vadd.f32 %v884_v52, %v691_v62  ;;  %v917_v40 = vadd.f32 %v885_v60, %v692_v0 }
 0x13d   : > { %v1281_v39 = vpop.permute.xlu1 %1280  ;;  %v1061_v31 = vpop.permute.xlu0 %1060 }
 0x13e   : > { %v1323_v53 = vadd.f32 %v1281_v39, %v1131_v49  ;;  %v1324_v21 = vadd.f32 %v1281_v39, %v1132_v41  ;;  %2301 = vmatprep.mubr.msk.f32.mxu1 %vm1372_vm0, %v1361_v63  ;;  %v1101_v20 = vmul.f32 %v1061_v31, %v2914_v45  ;;  %v1102_v2 = vmul.f32 %v1061_v31, %v2917_v46 }
 0x13f   : > { %2302 = vmatmul.mubr.msk.f32.gmra.mxu1 %vm1372_vm0, %v1362_v19 }
 0x140   : > { %v1355_v35 = vmax.f32 %v1323_v53, 0.0  ;;  %v1356_v36 = vmax.f32 %v1324_v21, 0.0  ;;  %v1133_v33 = vadd.f32 %v1101_v20, %v908_v1  ;;  %v1134_v17 = vadd.f32 %v1102_v2, %v909_v4 }
 0x141   : > { %v1297_v30 = vpop.permute.xlu1 %1296  ;;  %v1077_v38 = vpop.permute.xlu0 %1076 }
 0x142   : > { %v1331_v37 = vadd.f32 %v1297_v30, %v1139_v61  ;;  %v1332_v6 = vadd.f32 %v1297_v30, %v1140_v56  ;;  %2288 = vmatprep.mubr.msk.f32.mxu0 %vm1372_vm0, %v1355_v35  ;;  %v1109_v10 = vmul.f32 %v1077_v38, %v2914_v45  ;;  %v1110_v34 = vmul.f32 %v1077_v38, %v2917_v46 }
 0x143   : > { %2289 = vmatmul.mubr.msk.f32.gmra.mxu0 %vm1372_vm0, %v1356_v36 }
 0x144   : > { %v1363_v43 = vmax.f32 %v1331_v37, 0.0  ;;  %v1364_v55 = vmax.f32 %v1332_v6, 0.0  ;;  %v1141_v47 = vadd.f32 %v1109_v10, %v916_v9  ;;  %v1142_v8 = vadd.f32 %v1110_v34, %v917_v40 }
 0x145   : > { %v1301_v14 = vpop.permute.xlu1 %1300  ;;  %v1285_v5 = vpop.permute.xlu0 %1284 }
 0x146   : > { %2304 = vmatprep.mubr.msk.f32.mxu1 %vm1372_vm0, %v1363_v43  ;;  %v1333_v7 = vadd.f32 %v1301_v14, %v1141_v47  ;;  %v1334_v18 = vadd.f32 %v1301_v14, %v1142_v8  ;;  %v1325_v59 = vadd.f32 %v1285_v5, %v1133_v33  ;;  %v1326_v15 = vadd.f32 %v1285_v5, %v1134_v17 }
 0x147   : > { %2305 = vmatmul.mubr.msk.f32.gmra.mxu1 %vm1372_vm0, %v1364_v55 }
 0x148   : > { %v1365_v45 = vmax.f32 %v1333_v7, 0.0  ;;  %v1366_v46 = vmax.f32 %v1334_v18, 0.0  ;;  %v1357_v3 = vmax.f32 %v1325_v59, 0.0  ;;  %v1358_v22 = vmax.f32 %v1326_v15, 0.0 }
 0x14a   : > { %2291 = vmatprep.mubr.msk.f32.mxu0 %vm1372_vm0, %v1357_v3  ;;  %2307 = vmatprep.mubr.msk.f32.mxu1 %vm1372_vm0, %v1365_v45 }
 0x14b   : > { %2292 = vmatmul.mubr.msk.f32.gmra.mxu0 %vm1372_vm0, %v1358_v22  ;;  %2308 = vmatmul.mubr.msk.f32.gmra.mxu1 %vm1372_vm0, %v1366_v46 }
 0x193   : > { %v2252_v57 = vpop.f32.mrf.mxu0 }
 0x195   : > { %v1463_v44 = vpop.f32.mrf.mxu0 }
 0x19b   : > { %v2268_v25 = vpop.f32.mrf.mxu1 }
 0x19c   : > { %v1598_v42 = vadd.f32 %v2268_v25, %v2252_v57 }
 0x19d   : > { %v1592_v27 = vpop.f32.mrf.mxu1 }
 0x19e   : > { %v1593_v19 = vadd.f32 %v1592_v27, %v1463_v44 }
 0x1a7   : > { %v2255_v12 = vpop.f32.mrf.mxu0 }
 0x1a9   : > { %v1473_v28 = vpop.f32.mrf.mxu0 }
 0x1af   : > { %v2271_v23 = vpop.f32.mrf.mxu1 }
 0x1b0   : > { %v1608_v32 = vadd.f32 %v2271_v23, %v2255_v12 }
 0x1b1   : > { %v1602_v26 = vpop.f32.mrf.mxu1 }
 0x1b2   : > { %v1603_v60 = vadd.f32 %v1602_v26, %v1473_v28 }
 0x1b7   : > { %v2258_v29 = vpop.f32.mrf.mxu0 }
 0x1b9   : > { %v1483_v13 = vpop.f32.mrf.mxu0 }
 0x1c3   : > { %v2274_v49 = vpop.f32.mrf.mxu1 }
 0x1c4   : > { %v1618_v2 = vadd.f32 %v2274_v49, %v2258_v29 }
 0x1c5   : > { %v1612_v58 = vpop.f32.mrf.mxu1 }
 0x1c6   : > { %v1613_v1 = vadd.f32 %v1612_v58, %v1483_v13 }
 0x1cb   : > { %v2261_v41 = vpop.f32.mrf.mxu0 }
 0x1cd   : > { %v1493_v16 = vpop.f32.mrf.mxu0 }
 0x1d7   : > { %v2277_v11 = vpop.f32.mrf.mxu1 }
 0x1d8   : > { %v1628_v10 = vadd.f32 %v2277_v11, %v2261_v41 }
 0x1d9   : > { %v1622_v48 = vpop.f32.mrf.mxu1 }
 0x1da   : > { %v1623_v55 = vadd.f32 %v1622_v48, %v1493_v16 }
 0x1df   : > { %v2284_v50 = vpop.f32.mrf.mxu0 }
 0x1e0   : > { %v1764_v39 = vadd.f32 %v2284_v50, %v1598_v42 }
 0x1e1   : > { %v1724_v63 = vpop.f32.mrf.mxu0 }
 0x1e2   : > { %v1763_v24 = vadd.f32 %v1724_v63, %v1593_v19 }
 0x1eb   : > { %v2300_v51 = vpop.f32.mrf.mxu1 }
 0x1ec   : > { %v1904_v53 = vadd.f32 %v2300_v51, %v1764_v39 }
 0x1ed   : > { %v1864_v21 = vpop.f32.mrf.mxu1 }
 0x1ee   : > { %1913 = vst.msk [vmem:[%s3203_s22 + $0x8] sm:$0xff] %vm1911_vm1, %v1904_v53  ;;  %v1903_v31 = vadd.f32 %v1864_v21, %v1763_v24 }
 0x1f0   : > { %1912 = vst.msk [vmem:[%s3203_s22] sm:$0xff] %vm1911_vm1, %v1903_v31 }
 0x1f3   : > { %v2287_v54 = vpop.f32.mrf.mxu0 }
 0x1f4   : > { %v1766_v35 = vadd.f32 %v2287_v54, %v1608_v32 }
 0x1f5   : > { %v1734_v52 = vpop.f32.mrf.mxu0 }
 0x1f6   : > { %v1765_v61 = vadd.f32 %v1734_v52, %v1603_v60 }
 0x1ff   : > { %v2303_v36 = vpop.f32.mrf.mxu1 }
 0x200   : > { %v1906_v56 = vadd.f32 %v2303_v36, %v1766_v35 }
 0x201   : > { %v1874_v62 = vpop.f32.mrf.mxu1 }
 0x202   : > { %1915 = vst.msk [vmem:[%s3203_s22 + $0x18] sm:$0xff] %vm1911_vm1, %v1906_v56  ;;  %v1905_v0 = vadd.f32 %v1874_v62, %v1765_v61 }
 0x203   : > { %v2290_v20 = vpop.f32.mrf.mxu0 }
 0x204   : > { %1914 = vst.msk [vmem:[%s3203_s22 + $0x10] sm:$0xff] %vm1911_vm1, %v1905_v0  ;;  %v1768_v4 = vadd.f32 %v2290_v20, %v1618_v2 }
 0x205   : > { %v1744_v30 = vpop.f32.mrf.mxu0 }
 0x206   : > { %v1767_v6 = vadd.f32 %v1744_v30, %v1613_v1 }
 0x207   : > { %v2306_v37 = vpop.f32.mrf.mxu1 }
 0x208   : > { %v1908_v38 = vadd.f32 %v2306_v37, %v1768_v4 }
 0x209   : > { %v1884_v9 = vpop.f32.mrf.mxu1 }
 0x20a   : > { %1917 = vst.msk [vmem:[%s3203_s22 + $0x28] sm:$0xff] %vm1911_vm1, %v1908_v38  ;;  %v1907_v40 = vadd.f32 %v1884_v9, %v1767_v6 }
 0x20b   : > { %v2293_v34 = vpop.f32.mrf.mxu0  ;;  %v2309_v43 = vpop.f32.mrf.mxu1 }
 0x20c   : > { %1916 = vst.msk [vmem:[%s3203_s22 + $0x20] sm:$0xff] %vm1911_vm1, %v1907_v40  ;;  %v1770_v14 = vadd.f32 %v2293_v34, %v1628_v10 }
 0x20d   : > { %v1754_v47 = vpop.f32.mrf.mxu0  ;;  %v1894_v17 = vpop.f32.mrf.mxu1 }
 0x20e   : > { %v1910_v8 = vadd.f32 %v2309_v43, %v1770_v14  ;;  %v1769_v33 = vadd.f32 %v1754_v47, %v1623_v55 }
 0x210   : > { %1919 = vst.msk [vmem:[%s3203_s22 + $0x38] sm:$0xff] %vm1911_vm1, %v1910_v8  ;;  %v1909_v5 = vadd.f32 %v1894_v17, %v1769_v33 }
 0x212   : > { %1918 = vst.msk [vmem:[%s3203_s22 + $0x30] sm:$0xff] %vm1911_vm1, %v1909_v5 }
 0x213   : > { %2420 = shalt.err (!%p2417_p6)
}
 0x214   : > { %s2421_s11 = scalar_lea.hbm %s3222_s25, 1024  ;;  %s2425_s14 = scalar_lea.hbm %s3280_s4, 2048 }
 0x215   : > { %p2422_p7 = scmp.ne.s32.totalorder %s3222_s25, %s2421_s11  ;;  %p2426_p13 = scmp.lt.s32.totalorder %s3222_s25, %s3280_s4 }
 0x216   : > { %p2427_p2 = scmp.lt.s32.totalorder %s2425_s14, %s2421_s11 }
 0x217   : > { %p2423_p10 = pnand %p2422_p7, %p2572_p9 }
 0x218   : > { %p2428_p8 = por %p2427_p2, %p2426_p13 }
 0x219   : > { %p2424_p4 = pneg %p2423_p10 }
 0x21b   : > { %p2429_p12 = pnand %p2428_p8, %p2424_p4 }
 0x21d   : > { %2432 = shalt.err (!%p2429_p12)
}
 0x21e   : > { %s2494_s7 = smov 128   ;;  %s2495_s24 = smov 8  }
 0x21f   : > { %2312 = dma.vmem_to_hbm [thread:$0]  (%p2572_p9), %s3224_s27, 1024, %s3222_s25, %s1921_s18, %s2494_s7, %s2494_s7, %s2495_s24  }
 0x220 PF: > { %s1951_s26 = sand.u32 1, %s2467_s15   ;;  %p3286_p0 = scmp.ge.s32.totalorder %s2487_s20, 2 }
 0x221   : > { %s1952_s5 = scalar_lea.sflag [#allocation4], %s1951_s26 }
 0x222   : > { %p2319_p1 = pnand %p3286_p0, %p2579_p11 }
 0x224   : > { %p2320_p3 = pneg %p2319_p1 }
 0x226   : > { %2462 = dma.done.wait (%p2320_p3), %s1952_s5, 1024  }
 0x227   : > { %2464 = vsyncadd (%p2320_p3), %s1952_s5, 4294966272  ;;  %s20_s20 = sadd.s32 1, %s2487_s20   ;;  %s3287_s15 = smov %s2471_s16 }
 0x228   : > { %p17_p5 = scmp.ge.s32.totalorder %s20_s20, 4   ;;  %s3288_s16 = smov %s2475_s17 }
 0x229   : > { %s3289_s17 = smov %s2577_s29  ;;  %s3290_s18 = smov %s2483_s19 }
 0x22a   : > { %s3291_s19 = smov %s3293_s23  ;;  %19 = sbr.rel (!%p17_p5) target bundleno = 6 (0x6), region = 87 }
 0x22f   :  { %1957 = vsyncpa [#allocation3], 1 }
 0x230   :  { %1959 = vsyncpa [#allocation3 + $0x1], 1 }
 0x231   :  { %1960 = vsyncpa [#allocation4], 1 }
 0x232   :  { %1962 = vsyncpa [#allocation4 + $0x1], 1 }

</bundles_post_ra>
